<compile_context>
chip_gen: v7x
topology: tpu7x:2x2x1
jax: 0.10.0
libtpu: 0.0.40
codegen_flags: <defaults>
</compile_context>

<pallas_src>
import jax
import jax.numpy as jnp
from jax.experimental import pallas as pl
from jax.experimental.pallas import tpu as pltpu

_LANE = 128
_MAX_TILE_ROWS = 8192  # (8192, 128) f32 = 4 MiB per input block


def _tpu_info():
    """Best-effort (vmem_capacity_bytes, num_tensorcores) with safe fallbacks."""
    vmem_cap = 64 * 1024 * 1024  # conservative: v7x physical per-TC VMEM
    num_cores = 1
    try:
        info = pltpu.get_tpu_info()
        for name in ("vmem_capacity_bytes", "vmem_bytes", "vmem_size_bytes"):
            v = getattr(info, name, None)
            if v is None:
                continue
            try:
                v = int(v)
            except Exception:
                continue
            if v > 0:
                vmem_cap = v
                break
        for name in ("num_tensorcores", "tensorcore_count", "num_cores",
                     "core_count", "cores_per_chip", "num_tensor_cores"):
            v = getattr(info, name, None)
            if v is None:
                continue
            try:
                v = int(v)
            except Exception:
                continue
            if v > 0:
                num_cores = v
                break
    except Exception:
        pass
    if num_cores == 1:
        try:
            kind = jax.devices()[0].device_kind.lower()
            if "v7" in kind or "7x" in kind:
                num_cores = 2  # v7x: 2 TensorCores per chip
        except Exception:
            pass
    return vmem_cap, num_cores


def _sublane_multiple(dtype):
    # Packed dtypes need block rows in multiples of 16 (bf16) / 32 (int8/fp8).
    return {4: 8, 2: 16, 1: 32}.get(jnp.dtype(dtype).itemsize, 8)


def _make_kernel(num_preds, tile_rows, tiles_per_slice, rows_valid, need_mask,
                 multi_slice):
    n_sub = tile_rows // 8

    def vreg_sum(x):
        # (tile_rows, 128) -> (8, 128): elementwise vreg adds (pure VPU); the
        # cross-lane reduce happens once, in JAX, on the tiny output slab.
        return jnp.sum(x.reshape(n_sub, 8, _LANE), axis=0)

    def kernel(*refs):
        pred_refs = refs[:num_preds]
        gt_ref = refs[num_preds]
        out_ref = refs[num_preds + 1]

        if multi_slice:
            c = pl.program_id(0)
            t = pl.program_id(1)
        else:
            c = 0
            t = pl.program_id(0)

        @pl.when(t == 0)
        def _init():
            out_ref[...] = jnp.zeros_like(out_ref)

        def accumulate(mask):
            g = gt_ref[...].astype(jnp.float32)
            if mask is not None:
                g = jnp.where(mask, g, 0.0)
            # gt partial accumulated once per step, shared across all preds.
            out_ref[0, 2 * num_preds] += vreg_sum(g)
            for k in range(num_preds):
                p = pred_refs[k][...].astype(jnp.float32)
                if mask is not None:
                    p = jnp.where(mask, p, 0.0)
                out_ref[0, 2 * k + 0] += vreg_sum(p * g)   # intersection partial
                out_ref[0, 2 * k + 1] += vreg_sum(p)       # pred-sum partial

        if not need_mask:
            accumulate(None)
        else:
            row_start = (c * tiles_per_slice + t) * tile_rows
            is_full = row_start + tile_rows <= rows_valid

            @pl.when(is_full)
            def _fast():            # common case: unmasked, no iota/select work
                accumulate(None)

            @pl.when(jnp.logical_not(is_full))
            def _edge():            # final partial block and/or excess grid steps
                row_ids = row_start + jax.lax.broadcasted_iota(
                    jnp.int32, (tile_rows, 1), 0)
                accumulate(row_ids < rows_valid)

    return kernel


def _soft_iou_partials(preds, gt):
    """One fused pallas_call. Returns (K, 3) f32: [sum(p*g), sum(p), sum(g)]."""
    num_preds = len(preds)
    for p in preds:
        # TODO(synk): broadcasting preds vs gt_masks with different shapes is not supported.
        assert p.shape == gt.shape, (p.shape, gt.shape)

    n = int(gt.size)
    g_flat = jnp.ravel(gt)
    p_flats = [jnp.ravel(p) for p in preds]

    sub = max(_sublane_multiple(gt.dtype),
              *[_sublane_multiple(p.dtype) for p in preds])
    rows = n // _LANE
    n_kernel = rows * _LANE if rows >= sub else 0   # tiny inputs: pure JAX

    # Remainder (< 128 elems, or the whole tensor when tiny) in plain JAX.
    if n_kernel < n:
        tg = g_flat[n_kernel:].astype(jnp.float32)
        tails = []
        for pf in p_flats:
            tp = pf[n_kernel:].astype(jnp.float32)
            tails.append(jnp.stack([jnp.sum(tp * tg), jnp.sum(tp), jnp.sum(tg)]))
        tail = jnp.stack(tails)
    else:
        tail = jnp.zeros((num_preds, 3), jnp.float32)
    if n_kernel == 0:
        return tail

    # Copy-free lane-dense view when n is a multiple of 128 (the common case).
    # TODO(synk): for n % 128 != 0 the prefix slice below still materializes one
    # HBM copy per tensor before the kernel; a manual-DMA (pl.ANY) path would avoid it.
    def as_2d(flat):
        main = flat if n_kernel == n else flat[:n_kernel]
        return main.reshape(rows, _LANE)

    g2d = as_2d(g_flat)
    p2ds = [as_2d(pf) for pf in p_flats]

    # Generation-aware tile sizing: biggest block such that (K+1 inputs) x 2
    # pipeline buffers stay within ~40% of this chip's per-core VMEM.
    vmem_cap, num_cores = _tpu_info()
    per_row_bytes = _LANE * (gt.dtype.itemsize
                             + sum(p.dtype.itemsize for p in preds))
    budget = max(8 << 20, (vmem_cap * 2) // 5)
    budget_rows = budget // (2 * per_row_bytes)
    cap_rows = max(sub, min(_MAX_TILE_ROWS, (budget_rows // sub) * sub))
    tile_rows = min(cap_rows, (rows // sub) * sub)   # multiple of sub, <= rows

    total_tiles = pl.cdiv(rows, tile_rows)
    num_slices = num_cores if (num_cores > 1 and total_tiles >= num_cores) else 1
    tiles_per_slice = pl.cdiv(total_tiles, num_slices)
    need_mask = (rows % tile_rows != 0) or (
        num_slices * tiles_per_slice != total_tiles)

    kernel = _make_kernel(num_preds, tile_rows, tiles_per_slice, rows,
                          need_mask, num_slices > 1)

    out_shape = jax.ShapeDtypeStruct(
        (num_slices, 2 * num_preds + 1, 8, _LANE), jnp.float32)
    out_block = (1, 2 * num_preds + 1, 8, _LANE)

    if num_slices > 1:
        grid = (num_slices, tiles_per_slice)

        def in_map(c, t):
            # Clamp so any excess grid step re-reads the last block; such steps
            # are fully masked in the kernel, so this only avoids an OOB DMA.
            return (jnp.minimum(c * tiles_per_slice + t, total_tiles - 1), 0)

        out_map = lambda c, t: (c, 0, 0, 0)
        sem_options = ((pltpu.CORE_PARALLEL, pltpu.ARBITRARY),
                       ("parallel", "arbitrary"))
    else:
        grid = (total_tiles,)
        in_map = lambda t: (t, 0)
        out_map = lambda t: (0, 0, 0, 0)
        sem_options = (("arbitrary",),)

    in_specs = [pl.BlockSpec((tile_rows, _LANE), in_map)
                for _ in range(num_preds + 1)]
    out_specs = pl.BlockSpec(out_block, out_map)

    block_in_bytes = tile_rows * per_row_bytes
    vmem_limit = int(min(vmem_cap,
                         max(2 * block_in_bytes + (8 << 20), 32 << 20)))

    in_bytes = n_kernel * (gt.dtype.itemsize
                           + sum(p.dtype.itemsize for p in preds))
    out_bytes = num_slices * (2 * num_preds + 1) * 8 * _LANE * 4
    cost = pl.CostEstimate(flops=(3 * num_preds + 1) * n_kernel,
                           transcendentals=0,
                           bytes_accessed=in_bytes + out_bytes)

    partials = None
    last_err = None
    for sem in sem_options:
        try:
            partials = pl.pallas_call(
                kernel,
                out_shape=out_shape,
                grid=grid,
                in_specs=in_specs,
                out_specs=out_specs,
                compiler_params=pltpu.CompilerParams(
                    dimension_semantics=sem,
                    vmem_limit_bytes=vmem_limit),
                cost_estimate=cost,
            )(*p2ds, g2d)
            break
        except Exception as e:  # fallback if CORE_PARALLEL is rejected
            last_err = e
    if partials is None:
        raise last_err

    sums = jnp.sum(partials, axis=(0, 2, 3), dtype=jnp.float32)  # (2K+1,)
    inter = sums[0:2 * num_preds:2]
    psum = sums[1:2 * num_preds:2]
    gsum = sums[2 * num_preds]
    trips = jnp.stack(
        [inter, psum, jnp.broadcast_to(gsum, inter.shape)], axis=-1)
    return trips + tail


def _losses_from_triplets(trips):
    smooth = jnp.float32(1.0)
    inter = trips[..., 0]
    p_sum = trips[..., 1]
    g_sum = trips[..., 2]
    return 1.0 - (inter + smooth) / (p_sum + g_sum - inter + smooth)


def soft_iou_loss(preds, gt_masks):
    """Matches SoftIoULoss.forward: accepts a single tensor or a list/tuple."""
    if isinstance(preds, (list, tuple)):
        preds = list(preds)
        fuse = all(p.shape == gt_masks.shape for p in preds)
        if fuse:
            trips = _soft_iou_partials(preds, gt_masks)          # (K, 3)
            return jnp.mean(_losses_from_triplets(trips))
        total = jnp.float32(0.0)
        for p in preds:
            trip = _soft_iou_partials([p], gt_masks)[0]
            total = total + _losses_from_triplets(trip)
        return total / jnp.float32(len(preds))
    trip = _soft_iou_partials([preds], gt_masks)[0]
    return _losses_from_triplets(trip)


def _ref_loss(preds, gt_masks):
    """Pure-JAX reference (mirrors the PyTorch code)."""
    def one(pred):
        inter = jnp.sum(pred * gt_masks)
        return 1.0 - (inter + 1.0) / (jnp.sum(pred) + jnp.sum(gt_masks) - inter + 1.0)

    if isinstance(preds, (list, tuple)):
        return sum(one(p) for p in preds) / len(preds)
    return one(preds)


if __name__ == "__main__":
    key = jax.random.PRNGKey(0)
    k1, k2, k3, k4, k5 = jax.random.split(key, 5)

    # NCHW, small shapes.
    pred = jax.nn.sigmoid(jax.random.normal(k1, (2, 4, 16, 16), dtype=jnp.float32))
    gt = (jax.random.uniform(k2, (2, 4, 16, 16)) > 0.5).astype(jnp.float32)

    # Single-tensor path (copy-free lane-dense view, unmasked fast path).
    loss = jax.block_until_ready(soft_iou_loss(pred, gt))
    ref = _ref_loss(pred, gt)
    assert jnp.allclose(loss, ref, rtol=1e-5, atol=1e-5), (loss, ref)

    # List-of-preds path (one fused pallas_call streaming gt once).
    pred2 = jax.nn.sigmoid(jax.random.normal(k3, (2, 4, 16, 16), dtype=jnp.float32))
    loss_list = jax.block_until_ready(soft_iou_loss([pred, pred2], gt))
    ref_list = _ref_loss([pred, pred2], gt)
    assert jnp.allclose(loss_list, ref_list, rtol=1e-5, atol=1e-5), (loss_list, ref_list)

    # Ragged size: exercises the in-kernel edge mask and the <128-elem JAX tail.
    predr = jax.nn.sigmoid(jax.random.normal(k4, (2, 3, 19, 21), dtype=jnp.float32))
    gtr = (jax.random.uniform(k5, (2, 3, 19, 21)) > 0.5).astype(jnp.float32)
    loss_r = jax.block_until_ready(soft_iou_loss(predr, gtr))
    ref_r = _ref_loss(predr, gtr)
    assert jnp.allclose(loss_r, ref_r, rtol=1e-5, atol=1e-5), (loss_r, ref_r)

    print("KERNEL_OK")
</pallas_src>

<mosaic_0001>
module attributes {stable_mosaic.version = 11 : i64} {
  func.func @kernel(%arg0: i32, %arg1: memref<16x128xf32, #tpu.memory_space<vmem>>, %arg2: memref<16x128xf32, #tpu.memory_space<vmem>>, %arg3: memref<1x3x8x128xf32, #tpu.memory_space<vmem>>) attributes {dimension_semantics = [#tpu.dimension_semantics<arbitrary>], iteration_bounds = array<i64: 1>, scalar_prefetch = 0 : i64, scratch_operands = 0 : i64, tpu.core_type = #tpu.core_type<tc>, window_params = [{transform_indices = @transform_0, window_bounds = array<i64: 16, 128>}, {transform_indices = @transform_1, window_bounds = array<i64: 16, 128>}, {pipeline_mode = #tpu.pipeline_mode<synchronous>, transform_indices = @transform_2, window_bounds = array<i64: 1, 3, 8, 128>}]} {
    %c0_i32 = arith.constant 0 : i32
    %0 = arith.cmpi eq, %arg0, %c0_i32 : i32
    %1 = arith.extui %0 : i1 to i32
    %c0_i32_0 = arith.constant 0 : i32
    %2 = arith.cmpi ne, %1, %c0_i32_0 : i32
    scf.if %2 {
      %cst_28 = arith.constant 0.000000e+00 : f32
      %30 = vector.broadcast %cst_28 : f32 to vector<1x3x8x128xf32>
      %c0_29 = arith.constant 0 : index
      %c0_30 = arith.constant 0 : index
      %c0_31 = arith.constant 0 : index
      %c0_32 = arith.constant 0 : index
      %31 = vector.load %arg3[%c0_29, %c0_30, %c0_31, %c0_32] : memref<1x3x8x128xf32, #tpu.memory_space<vmem>>, vector<1x3x8x128xf32>
      tpu.vector_store %arg3[%c0_29, %c0_30, %c0_31, %c0_32], %30 {strides = array<i32>} : memref<1x3x8x128xf32, #tpu.memory_space<vmem>>, vector<1x3x8x128xf32>,
    } else {
    }
    %c0 = arith.constant 0 : index
    %c0_1 = arith.constant 0 : index
    %3 = vector.load %arg2[%c0, %c0_1] : memref<16x128xf32, #tpu.memory_space<vmem>>, vector<16x128xf32>
    %c0_2 = arith.constant 0 : index
    %c2 = arith.constant 2 : index
    %c0_3 = arith.constant 0 : index
    %c0_4 = arith.constant 0 : index
    %4 = vector.load %arg3[%c0_2, %c2, %c0_3, %c0_4] : memref<1x3x8x128xf32, #tpu.memory_space<vmem>>, vector<1x1x8x128xf32>
    %5 = vector.shape_cast %4 : vector<1x1x8x128xf32> to vector<8x128xf32>
    %6 = vector.shape_cast %3 : vector<16x128xf32> to vector<2x8x128xf32>
    %cst = arith.constant dense<0.000000e+00> : vector<8x128xf32>
    %7 = vector.multi_reduction <add>, %6, %cst [0] : vector<2x8x128xf32> to vector<8x128xf32>
    %8 = arith.addf %5, %7 : vector<8x128xf32>
    %c0_5 = arith.constant 0 : index
    %c2_6 = arith.constant 2 : index
    %c0_7 = arith.constant 0 : index
    %c0_8 = arith.constant 0 : index
    %9 = vector.load %arg3[%c0_5, %c2_6, %c0_7, %c0_8] : memref<1x3x8x128xf32, #tpu.memory_space<vmem>>, vector<1x1x8x128xf32>
    %10 = vector.shape_cast %9 : vector<1x1x8x128xf32> to vector<8x128xf32>
    %11 = vector.shape_cast %8 : vector<8x128xf32> to vector<1x1x8x128xf32>
    tpu.vector_store %arg3[%c0_5, %c2_6, %c0_7, %c0_8], %11 {strides = array<i32>} : memref<1x3x8x128xf32, #tpu.memory_space<vmem>>, vector<1x1x8x128xf32>,
    %c0_9 = arith.constant 0 : index
    %c0_10 = arith.constant 0 : index
    %12 = vector.load %arg1[%c0_9, %c0_10] : memref<16x128xf32, #tpu.memory_space<vmem>>, vector<16x128xf32>
    %c0_11 = arith.constant 0 : index
    %c0_12 = arith.constant 0 : index
    %c0_13 = arith.constant 0 : index
    %c0_14 = arith.constant 0 : index
    %13 = vector.load %arg3[%c0_11, %c0_12, %c0_13, %c0_14] : memref<1x3x8x128xf32, #tpu.memory_space<vmem>>, vector<1x1x8x128xf32>
    %14 = vector.shape_cast %13 : vector<1x1x8x128xf32> to vector<8x128xf32>
    %15 = arith.mulf %12, %3 : vector<16x128xf32>
    %16 = vector.shape_cast %15 : vector<16x128xf32> to vector<2x8x128xf32>
    %cst_15 = arith.constant dense<0.000000e+00> : vector<8x128xf32>
    %17 = vector.multi_reduction <add>, %16, %cst_15 [0] : vector<2x8x128xf32> to vector<8x128xf32>
    %18 = arith.addf %14, %17 : vector<8x128xf32>
    %c0_16 = arith.constant 0 : index
    %c0_17 = arith.constant 0 : index
    %c0_18 = arith.constant 0 : index
    %c0_19 = arith.constant 0 : index
    %19 = vector.load %arg3[%c0_16, %c0_17, %c0_18, %c0_19] : memref<1x3x8x128xf32, #tpu.memory_space<vmem>>, vector<1x1x8x128xf32>
    %20 = vector.shape_cast %19 : vector<1x1x8x128xf32> to vector<8x128xf32>
    %21 = vector.shape_cast %18 : vector<8x128xf32> to vector<1x1x8x128xf32>
    tpu.vector_store %arg3[%c0_16, %c0_17, %c0_18, %c0_19], %21 {strides = array<i32>} : memref<1x3x8x128xf32, #tpu.memory_space<vmem>>, vector<1x1x8x128xf32>,
    %c0_20 = arith.constant 0 : index
    %c1 = arith.constant 1 : index
    %c0_21 = arith.constant 0 : index
    %c0_22 = arith.constant 0 : index
    %22 = vector.load %arg3[%c0_20, %c1, %c0_21, %c0_22] : memref<1x3x8x128xf32, #tpu.memory_space<vmem>>, vector<1x1x8x128xf32>
    %23 = vector.shape_cast %22 : vector<1x1x8x128xf32> to vector<8x128xf32>
    %24 = vector.shape_cast %12 : vector<16x128xf32> to vector<2x8x128xf32>
    %cst_23 = arith.constant dense<0.000000e+00> : vector<8x128xf32>
    %25 = vector.multi_reduction <add>, %24, %cst_23 [0] : vector<2x8x128xf32> to vector<8x128xf32>
    %26 = arith.addf %23, %25 : vector<8x128xf32>
    %c0_24 = arith.constant 0 : index
    %c1_25 = arith.constant 1 : index
    %c0_26 = arith.constant 0 : index
    %c0_27 = arith.constant 0 : index
    %27 = vector.load %arg3[%c0_24, %c1_25, %c0_26, %c0_27] : memref<1x3x8x128xf32, #tpu.memory_space<vmem>>, vector<1x1x8x128xf32>
    %28 = vector.shape_cast %27 : vector<1x1x8x128xf32> to vector<8x128xf32>
    %29 = vector.shape_cast %26 : vector<8x128xf32> to vector<1x1x8x128xf32>
    tpu.vector_store %arg3[%c0_24, %c1_25, %c0_26, %c0_27], %29 {strides = array<i32>} : memref<1x3x8x128xf32, #tpu.memory_space<vmem>>, vector<1x1x8x128xf32>,
    return
  }
  func.func @transform_0(%arg0: i32) -> (i32, i32) {
    %c0_i32 = arith.constant 0 : i32
    %c0_i32_0 = arith.constant 0 : i32
    return %arg0, %c0_i32 : i32, i32
  }
  func.func @transform_1(%arg0: i32) -> (i32, i32) {
    %c0_i32 = arith.constant 0 : i32
    %c0_i32_0 = arith.constant 0 : i32
    return %arg0, %c0_i32 : i32, i32
  }
  func.func @transform_2(%arg0: i32) -> (i32, i32, i32, i32) {
    %c0_i32 = arith.constant 0 : i32
    %c0_i32_0 = arith.constant 0 : i32
    %c0_i32_1 = arith.constant 0 : i32
    %c0_i32_2 = arith.constant 0 : i32
    %c0_i32_3 = arith.constant 0 : i32
    return %c0_i32, %c0_i32_0, %c0_i32_1, %c0_i32_2 : i32, i32, i32, i32
  }
}

</mosaic_0001>

<bundles_post_ra>
// kernel: tpu_custom_call.1
= control target key start
LH: loop header
LB: loop body
LE: loop exit
PB: predicated region body
PF: predicated region fallthrough
CT: control target
= control target key end

     0   :  { %7 = vsyncpa [#allocation3], 0  ;;  %s228_s0 = inlined_call_operand.hbm [shape: f32[16,128], index: 0, kind: input, shape index: {}]   ;;  %s229_s1 = inlined_call_operand.hbm [shape: f32[16,128], index: 1, kind: input, shape index: {}]   ;;  %s230_s2 = inlined_call_operand.hbm [shape: f32[1,3,8,128], index: 2, kind: output, shape index: {}]  }
   0x1   :  { %8 = vsyncpa [#allocation6], 0 }
   0x2   :  { %9 = vsyncpa [#allocation4], 0  ;;  %s163_s9 = smov [#allocation2]   ;;  %s91_s13 = scalar_lea.hbm %s228_s0, 256 }
   0x3   :  { %s15_s10 = sshll.u32 %s163_s9, 4  ;;  %p92_p0 = scmp.ne.s32.totalorder %s228_s0, %s91_s13  ;;  %s16_s10 = int_to_ptr.vmem [resolvable:$true] %s15_s10 }
   0x4   :  { %p95_p1 = scmp.lt.u32.totalorder %s91_s13, %s228_s0 }
   0x6   :  { %p97_p2 = pnand %p95_p1, %p92_p0 }
   0x8   :  { %100 = shalt.err (!%p97_p2)
}
   0x9   :  { %s101_s18 = scalar_lea.vmem %s16_s10, 256  ;;  %p106_p4 = scmp.lt.s32.totalorder %s16_s10, %s16_s10 }
   0xa   :  { %p102_p3 = scmp.ne.s32.totalorder %s16_s10, %s101_s18  ;;  %p107_p5 = scmp.lt.s32.totalorder %s101_s18, %s101_s18 }
   0xc   :  { %p108_p6 = por %p107_p5, %p106_p4 }
   0xe   :  { %p109_p7 = pnand %p108_p6, %p102_p3 }
  0x10   :  { %112 = shalt.err (!%p109_p7)
}
  0x11   :  { %s164_s19 = smov 128   ;;  %s165_s20 = smov 8  }
  0x12   :  { %21 = dma.hbm_to_vmem [thread:$0]  %s228_s0, 256, %s16_s10, [#allocation3], %s164_s19, %s164_s19, %s165_s20  }
  0x13   :  { %s166_s23 = smov [#allocation5]   ;;  %s113_s27 = scalar_lea.hbm %s229_s1, 256 }
  0x14   :  { %s27_s24 = sshll.u32 %s166_s23, 4  ;;  %p114_p8 = scmp.ne.s32.totalorder %s229_s1, %s113_s27  ;;  %s28_s24 = int_to_ptr.vmem [resolvable:$true] %s27_s24 }
  0x15   :  { %p117_p9 = scmp.lt.u32.totalorder %s113_s27, %s229_s1 }
  0x17   :  { %p119_p10 = pnand %p117_p9, %p114_p8 }
  0x19   :  { %122 = shalt.err (!%p119_p10)
}
  0x1a   :  { %s123_s4 = scalar_lea.vmem %s28_s24, 256  ;;  %p128_p12 = scmp.lt.s32.totalorder %s28_s24, %s28_s24 }
  0x1b   :  { %p124_p11 = scmp.ne.s32.totalorder %s28_s24, %s123_s4  ;;  %p129_p13 = scmp.lt.s32.totalorder %s123_s4, %s123_s4 }
  0x1d   :  { %p130_p0 = por %p129_p13, %p128_p12 }
  0x1f   :  { %p131_p1 = pnand %p130_p0, %p124_p11 }
  0x21   :  { %134 = shalt.err (!%p131_p1)
}
  0x22   :  { %33 = dma.hbm_to_vmem [thread:$0]  %s229_s1, 256, %s28_s24, [#allocation6], %s164_s19, %s164_s19, %s165_s20  }
  0x23   :  { %157 = dma.done.wait [#allocation3], 256  }
  0x24   :  { %158 = vsyncadd [#allocation3], 4294967040 }
  0x25   :  { %159 = dma.done.wait [#allocation6], 256  }
  0x26   :  { %160 = vsyncadd [#allocation6], 4294967040  ;;  %v47_v0 = vld [vmem:[#allocation5] sm:$0xff]  ;;  %v48_v1 = vld [vmem:[#allocation5 + $0x8] sm:$0xff]  ;;  %s167_s6 = smov [#allocation7]  }
  0x27   :  { %v54_v2 = vld [vmem:[#allocation2] sm:$0xff]  ;;  %v51_v3 = vadd.f32 %v48_v1, %v47_v0  ;;  %v55_v4 = vld [vmem:[#allocation2 + $0x8] sm:$0xff]  ;;  %s72_s7 = sshll.u32 %s167_s6, 4  ;;  %s73_s7 = int_to_ptr.vmem [resolvable:$true] %s72_s7 }
  0x28   :  { %v57_v5 = vmul.f32 %v54_v2, %v47_v0  ;;  %v58_v6 = vmul.f32 %v55_v4, %v48_v1  ;;  %v64_v7 = vadd.f32 %v55_v4, %v54_v2  ;;  %s135_s1 = scalar_lea.vmem %s73_s7, 384  ;;  %p140_p3 = scmp.lt.s32.totalorder %s73_s7, %s73_s7 }
  0x29   :  { %53 = vst [vmem:[#allocation7 + $0x10] sm:$0xff] %v51_v3  ;;  %p136_p2 = scmp.ne.s32.totalorder %s73_s7, %s135_s1  ;;  %p141_p4 = scmp.lt.s32.totalorder %s135_s1, %s135_s1 }
  0x2a   :  { %v59_v8 = vadd.f32 %v58_v6, %v57_v5  ;;  %66 = vst [vmem:[#allocation7 + $0x8] sm:$0xff] %v64_v7 }
  0x2b   :  { %p142_p5 = por %p141_p4, %p140_p3 }
  0x2c   :  { %61 = vst [vmem:[#allocation7] sm:$0xff] %v59_v8 }
  0x2d   :  { %p143_p6 = pnand %p142_p5, %p136_p2 }
  0x2f   :  { %146 = shalt.err (!%p143_p6)
}
  0x30   :  { %s147_s10 = scalar_lea.hbm %s230_s2, 384 }
  0x31   :  { %p148_p7 = scmp.ne.s32.totalorder %s230_s2, %s147_s10  ;;  %p151_p8 = scmp.lt.u32.totalorder %s147_s10, %s230_s2 }
  0x33   :  { %p153_p9 = pnand %p151_p8, %p148_p7 }
  0x35   :  { %156 = shalt.err (!%p153_p9)
}
  0x36   :  { %78 = dma.vmem_to_hbm [thread:$0]  %s73_s7, 384, %s230_s2, [#allocation4], %s164_s19, %s164_s19, %s165_s20  }
  0x37   :  { %161 = dma.done.wait [#allocation4], 384  }
  0x38   :  { %162 = vsyncadd [#allocation4], 4294966912 }
  0x39   :  { %82 = vsyncpa [#allocation3], 1 }
  0x3a   :  { %83 = vsyncpa [#allocation6], 1 }
  0x3b   :  { %84 = vsyncpa [#allocation4], 1 }

</bundles_post_ra>
